<compile_context>
chip_gen: v5e
topology: v5e:2x2
jax: 0.10.0
libtpu: 0.0.40
codegen_flags: <defaults>
</compile_context>

<pallas_src>
import functools
import math

import jax
import jax.numpy as jnp
from jax.experimental import pallas as pl
from jax.experimental.pallas import tpu as pltpu


def _round_up(x, m):
    return ((x + m - 1) // m) * m


def _choose_tiles(B, N, orig_ch, vmem_budget_bytes):
    """Pick (Bb, TN, N_pad) from a per-step VMEM budget."""
    n128 = _round_up(max(N, 1), 128)
    # per-lane bytes of one grid step, double-buffered, f32:
    #   output rows (sublane-padded) + 8 sublane-padded input rows
    rows = _round_up(orig_ch, 8) + 8
    bytes_per_lane = 2 * rows * 4
    tn_cap = max(128, (vmem_budget_bytes // bytes_per_lane) // 128 * 128)
    tn = min(8192, tn_cap, n128)

    if tn < n128:
        # Bound padding waste (dead HBM writeback) to <~10% of N.
        while tn > 128 and (_round_up(N, tn) - N) * 10 > N:
            tn -= 128

    # v7x: keep >=2 grid steps so both TensorCores get work.  Only do this
    # when N is large enough that the extra edge padding (<256 lanes) is small.
    if B == 1 and tn == n128 and n128 >= 2048:
        tn = _round_up(n128 // 2, 128)

    n_pad = _round_up(N, tn)
    n_steps = n_pad // tn

    # Batch blocking: when each batch is a single N tile, group batches per
    # grid step (VMEM-budgeted, keep >=2 total steps for v7x).
    bb = 1
    if n_steps == 1 and B > 1:
        per_batch_bytes = bytes_per_lane * tn
        max_bb = max(1, vmem_budget_bytes // per_batch_bytes)
        for cand in range(min(max_bb, B // 2), 0, -1):
            if B % cand == 0:
                bb = cand
                break
    return bb, tn, n_pad


def _pe3d_kernel(pos_ref, out_ref, *, orig_ch, channels):
    # pos_ref: (Bb, 3, TN)        xyz coordinates for this (batch-block, N-tile)
    # out_ref: (Bb, orig_ch, TN)  encoding rows on sublanes, positions on lanes
    half = channels // 2
    bb = out_ref.shape[0]
    tn = out_ref.shape[2]

    # inv_freq = 1 / 10000**(2k/channels), k = 0..half-1, built sublane-major so
    # no lane->sublane relayout is needed.  (exp-form agrees with the pow-form
    # reference to ~1e-7 relative; not bit-identical.)
    k = jax.lax.broadcasted_iota(jnp.int32, (1, half, 1), 1).astype(jnp.float32)
    inv = jnp.exp(k * jnp.float32(-2.0 * math.log(10000.0) / channels))
    # Hoist the lane/batch broadcast out of the 3-axis loop (JAX doesn't CSE it).
    inv_b = jnp.broadcast_to(inv, (bb, half, tn))

    # Channel-row layout (matches torch cat order, truncated to orig_ch):
    #   [sin_x | cos_x | sin_y | cos_y | sin_z | cos_z], each block `half` rows.
    for a in range(3):
        lo = 2 * a * half
        if lo >= orig_ch:
            break  # remaining axes fully truncated away
        rows = min(2 * half, orig_ch - lo)
        rows_sin = min(half, rows)
        rows_cos = rows - rows_sin

        p = pos_ref[:, a:a + 1, :]                 # (Bb, 1, TN)
        s = inv_b[:, :rows_sin, :] * p             # (Bb, rows_sin, TN)

        # Slice the phase *before* the transcendental: no VPU work on rows that
        # the orig_ch truncation throws away.
        parts = [jnp.sin(s)]
        if rows_cos > 0:
            parts.append(jnp.cos(s[:, :rows_cos, :]))
        block = parts[0] if len(parts) == 1 else jnp.concatenate(parts, axis=1)

        # One store per axis (merged sin+cos) instead of two misaligned stores.
        out_ref[:, lo:lo + rows, :] = block.astype(out_ref.dtype)


def positional_encoding_3d(tensor, orig_ch, out_dtype=jnp.float32):
    """tensor: (B, N, >=3) float; returns (B, orig_ch, N) in out_dtype."""
    B, N, _ = tensor.shape

    # Parameter setup identical to the PyTorch __init__ (deterministic).
    channels = int(math.ceil(orig_ch / 6) * 2)
    if channels % 2:  # dead branch (channels is always even) -- kept for fidelity
        channels += 1
    half = channels // 2
    assert 3 * channels >= orig_ch

    bb, tn, n_pad = _choose_tiles(B, N, orig_ch,
                                  vmem_budget_bytes=12 * 1024 * 1024)

    # Glue: present coordinates as (B, 3, N_pad), lane-dense in N.  With
    # allow_input_fusion XLA may fuse this slice/transpose/pad straight into
    # the pallas input instead of a separate HBM round trip.
    pos = jnp.transpose(tensor[:, :, :3], (0, 2, 1)).astype(jnp.float32)
    if n_pad != N:
        pos = jnp.pad(pos, ((0, 0), (0, 0), (0, n_pad - N)))

    kernel = functools.partial(_pe3d_kernel, orig_ch=orig_ch, channels=channels)

    out_itemsize = jnp.dtype(out_dtype).itemsize
    cost = pl.CostEstimate(
        flops=int(B * n_pad * (3 * half + orig_ch)),
        transcendentals=int(B * n_pad * orig_ch),
        bytes_accessed=int(B * n_pad * (3 * 4 + orig_ch * out_itemsize)),
    )

    out = pl.pallas_call(
        kernel,
        out_shape=jax.ShapeDtypeStruct((B, orig_ch, n_pad), out_dtype),
        grid_spec=pl.GridSpec(
            grid=(B // bb, n_pad // tn),
            in_specs=[pl.BlockSpec((bb, 3, tn), lambda b, n: (b, 0, n))],
            out_specs=pl.BlockSpec((bb, orig_ch, tn), lambda b, n: (b, 0, n)),
        ),
        compiler_params=pltpu.CompilerParams(
            dimension_semantics=("parallel", "parallel"),
            vmem_limit_bytes=32 * 1024 * 1024,
            allow_input_fusion=[True],
        ),
        cost_estimate=cost,
    )(pos)

    if n_pad != N:
        out = out[:, :, :N]  # NOTE: must be kept if this wrapper is refactored
    return out


def _reference(tensor, orig_ch):
    """Pure-JAX port of the PyTorch forward, for correctness checking."""
    channels = int(math.ceil(orig_ch / 6) * 2)
    if channels % 2:
        channels += 1
    inv_freq = 1.0 / (10000.0 ** (jnp.arange(0, channels, 2, dtype=jnp.float32) / channels))
    pos_x, pos_y, pos_z = tensor[:, :, 0], tensor[:, :, 1], tensor[:, :, 2]
    sx = jnp.einsum('bi,j->bij', pos_x, inv_freq)
    sy = jnp.einsum('bi,j->bij', pos_y, inv_freq)
    sz = jnp.einsum('bi,j->bij', pos_z, inv_freq)
    ex = jnp.concatenate([jnp.sin(sx), jnp.cos(sx)], axis=-1)
    ey = jnp.concatenate([jnp.sin(sy), jnp.cos(sy)], axis=-1)
    ez = jnp.concatenate([jnp.sin(sz), jnp.cos(sz)], axis=-1)
    emb = jnp.concatenate([ex, ey, ez], axis=-1)
    return jnp.transpose(emb[:, :, :orig_ch], (0, 2, 1))


def _check(x, orig_ch):
    out = jax.block_until_ready(positional_encoding_3d(x, orig_ch))
    ref = _reference(x, orig_ch)
    assert out.shape == ref.shape, (out.shape, ref.shape)
    err = float(jnp.max(jnp.abs(out - ref)))
    assert jnp.allclose(out, ref, atol=1e-5, rtol=1e-5), err


if __name__ == "__main__":
    key = jax.random.PRNGKey(0)

    # Case 1: small canonical shape (B, N, 3), orig_ch = 32.
    x1 = jax.random.uniform(key, (2, 8, 3), dtype=jnp.float32, minval=0.0, maxval=10.0)
    _check(x1, 32)

    # Case 2: N not a multiple of 128 and orig_ch that truncates mid-block.
    x2 = jax.random.uniform(jax.random.PRNGKey(1), (1, 200, 3),
                            dtype=jnp.float32, minval=0.0, maxval=10.0)
    _check(x2, 10)

    # Case 3: large-B / small-N path (batch blocking, Bb > 1).
    x3 = jax.random.uniform(jax.random.PRNGKey(2), (8, 64, 3),
                            dtype=jnp.float32, minval=0.0, maxval=10.0)
    _check(x3, 32)

    # Case 4: B == 1 with larger N (TN clamp -> 2 grid steps, edge padding).
    x4 = jax.random.uniform(jax.random.PRNGKey(3), (1, 2500, 3),
                            dtype=jnp.float32, minval=0.0, maxval=10.0)
    _check(x4, 32)

    print("KERNEL_OK")
</pallas_src>

<mosaic_0001>
module attributes {stable_mosaic.version = 11 : i64} {
  func.func @_pe3d_kernel(%arg0: i32, %arg1: i32, %arg2: memref<1x3x128xf32, #tpu.memory_space<vmem>>, %arg3: memref<1x32x128xf32, #tpu.memory_space<vmem>>) attributes {dimension_semantics = [#tpu.dimension_semantics<parallel>, #tpu.dimension_semantics<parallel>], iteration_bounds = array<i64: 2, 1>, scalar_prefetch = 0 : i64, scratch_operands = 0 : i64, tpu.core_type = #tpu.core_type<tc>, window_params = [{transform_indices = @transform_0, window_bounds = array<i64: 1, 3, 128>}, {transform_indices = @transform_1, window_bounds = array<i64: 1, 32, 128>}]} {
    %0 = tpu.iota {dimensions = array<i32: 1>} : vector<1x6x1xi32>
    %1 = arith.sitofp %0 : vector<1x6x1xi32> to vector<1x6x1xf32>
    %cst = arith.constant -1.53505671 : f32
    %2 = vector.broadcast %cst : f32 to vector<1x6x1xf32>
    %3 = arith.mulf %1, %2 : vector<1x6x1xf32>
    %4 = math.exp %3 : vector<1x6x1xf32>
    %5 = vector.shape_cast %4 : vector<1x6x1xf32> to vector<1x6x1xf32>
    %6 = vector.broadcast %5 : vector<1x6x1xf32> to vector<1x6x128xf32>
    %c0 = arith.constant 0 : index
    %c0_0 = arith.constant 0 : index
    %c0_1 = arith.constant 0 : index
    %7 = vector.load %arg2[%c0, %c0_0, %c0_1] : memref<1x3x128xf32, #tpu.memory_space<vmem>>, vector<1x1x128xf32>
    %8 = vector.broadcast %7 : vector<1x1x128xf32> to vector<1x6x128xf32>
    %9 = arith.mulf %6, %8 : vector<1x6x128xf32>
    %10 = math.sin %9 : vector<1x6x128xf32>
    %11 = math.cos %9 : vector<1x6x128xf32>
    %12 = tpu.concatenate %10, %11 in 1 : vector<1x6x128xf32>, vector<1x6x128xf32> -> vector<1x12x128xf32>
    %c0_2 = arith.constant 0 : index
    %c0_3 = arith.constant 0 : index
    %c0_4 = arith.constant 0 : index
    %13 = vector.load %arg3[%c0_2, %c0_3, %c0_4] : memref<1x32x128xf32, #tpu.memory_space<vmem>>, vector<1x12x128xf32>
    tpu.vector_store %arg3[%c0_2, %c0_3, %c0_4], %12 {strides = array<i32>} : memref<1x32x128xf32, #tpu.memory_space<vmem>>, vector<1x12x128xf32>,
    %c0_5 = arith.constant 0 : index
    %c1 = arith.constant 1 : index
    %c0_6 = arith.constant 0 : index
    %14 = vector.load %arg2[%c0_5, %c1, %c0_6] : memref<1x3x128xf32, #tpu.memory_space<vmem>>, vector<1x1x128xf32>
    %15 = vector.broadcast %14 : vector<1x1x128xf32> to vector<1x6x128xf32>
    %16 = arith.mulf %6, %15 : vector<1x6x128xf32>
    %17 = math.sin %16 : vector<1x6x128xf32>
    %18 = math.cos %16 : vector<1x6x128xf32>
    %19 = tpu.concatenate %17, %18 in 1 : vector<1x6x128xf32>, vector<1x6x128xf32> -> vector<1x12x128xf32>
    %c0_7 = arith.constant 0 : index
    %c12 = arith.constant 12 : index
    %c0_8 = arith.constant 0 : index
    %20 = vector.load %arg3[%c0_7, %c12, %c0_8] : memref<1x32x128xf32, #tpu.memory_space<vmem>>, vector<1x12x128xf32>
    tpu.vector_store %arg3[%c0_7, %c12, %c0_8], %19 {strides = array<i32>} : memref<1x32x128xf32, #tpu.memory_space<vmem>>, vector<1x12x128xf32>,
    %c0_9 = arith.constant 0 : index
    %c2 = arith.constant 2 : index
    %c0_10 = arith.constant 0 : index
    %21 = vector.load %arg2[%c0_9, %c2, %c0_10] : memref<1x3x128xf32, #tpu.memory_space<vmem>>, vector<1x1x128xf32>
    %22 = vector.broadcast %21 : vector<1x1x128xf32> to vector<1x6x128xf32>
    %23 = arith.mulf %6, %22 : vector<1x6x128xf32>
    %24 = math.sin %23 : vector<1x6x128xf32>
    %25 = vector.extract_strided_slice %23 {offsets = [0, 0, 0], sizes = [1, 2, 128], strides = [1, 1, 1]} : vector<1x6x128xf32> to vector<1x2x128xf32>
    %26 = math.cos %25 : vector<1x2x128xf32>
    %27 = tpu.concatenate %24, %26 in 1 : vector<1x6x128xf32>, vector<1x2x128xf32> -> vector<1x8x128xf32>
    %c0_11 = arith.constant 0 : index
    %c24 = arith.constant 24 : index
    %c0_12 = arith.constant 0 : index
    %28 = vector.load %arg3[%c0_11, %c24, %c0_12] : memref<1x32x128xf32, #tpu.memory_space<vmem>>, vector<1x8x128xf32>
    tpu.vector_store %arg3[%c0_11, %c24, %c0_12], %27 {strides = array<i32>} : memref<1x32x128xf32, #tpu.memory_space<vmem>>, vector<1x8x128xf32>,
    return
  }
  func.func @transform_0(%arg0: i32, %arg1: i32) -> (i32, i32, i32) {
    %c0_i32 = arith.constant 0 : i32
    %c0_i32_0 = arith.constant 0 : i32
    return %arg0, %c0_i32, %arg1 : i32, i32, i32
  }
  func.func @transform_1(%arg0: i32, %arg1: i32) -> (i32, i32, i32) {
    %c0_i32 = arith.constant 0 : i32
    %c0_i32_0 = arith.constant 0 : i32
    return %arg0, %c0_i32, %arg1 : i32, i32, i32
  }
}

</mosaic_0001>

<bundles_post_ra>
// kernel: tpu_custom_call.1
= control target key start
LH: loop header
LB: loop body
LE: loop exit
PB: predicated region body
PF: predicated region fallthrough
CT: control target
= control target key end

     0   :  { %6 = vsyncpa [#allocation3], 0  ;;  %s1819_s0 = inlined_call_operand.vmem [shape: f32[2,3,128], index: 0, kind: input, shape index: {}]   ;;  %s1820_s1 = inlined_call_operand.hbm [shape: f32[2,32,128], index: 1, kind: output, shape index: {}]  }
   0x1   :  { %8 = vsyncpa [#allocation3 + $0x1], 0  ;;  %s1388_s6 = smov 0   ;;  %s1390_s7 = smov 0  }
   0x2   :  { %s1392_s8 = smov 0   ;;  %s1394_s9 = smov 0  }
   0x3   :  { %s1396_s10 = smov 0   ;;  %s1398_s11 = smov 0  }
   0x4 LB: > { %s1189_s12 = sadd.s32 4294967295, %s1367_s11   ;;  %s1190_s13 = sadd.s32 4294967294, %s1367_s11   ;;  %s1367_s11 = sphi %s1398_s11, %s14_s11   ;;  %s1363_s10 = sphi %s1396_s10, %s1833_s10   ;;  %s1359_s9 = sphi %s1394_s9, %s1832_s9   ;;  %s1355_s8 = sphi %s1392_s8, %s1831_s8   ;;  %s1351_s7 = sphi %s1390_s7, %s1830_s7   ;;  %s1347_s6 = sphi %s1388_s6, %s1829_s6  }
   0x5   : > { %s26_s14 = sadd.s32 1, %s1363_s10  ;;  %s63_s15 = sadd.s32 1, %s1355_s8 }
   0x6   : > { %p28_p0 = scmp.ge.s32.totalorder %s26_s14, 2  ;;  %p73_p1 = scmp.ne.s32.totalorder %s1355_s8, %s1351_s7 }
   0x7   : > { %p74_p2 = scmp.eq.s32.totalorder %s1189_s12, 1  ;;  %p79_p3 = scmp.ne.s32.totalorder %s1351_s7, %s1347_s6 }
   0x8   : > { %s1835_s14 = smov (%p28_p0, %s26_s14), 0  ;;  %p80_p5 = scmp.eq.s32.totalorder %s1190_s13, 1 }
   0x9   : > { %p1428_p4 = por %p74_p2, %p73_p1  ;;  %s58_s17 = ssub.s32 %s1363_s10, %s1835_s14 }
   0xa   : > { %p1193_p6 = scmp.ge.s32.totalorder %s1367_s11, 1  ;;  %p61_p7 = scmp.eq.s32.totalorder %s58_s17, 0 }
   0xb   : > { %p1435_p8 = por %p80_p5, %p79_p3  ;;  %p108_p9 = scmp.lt.s32.totalorder %s1367_s11, 3 }
   0xc   : > { %s1441_s19 = scalar_select %p61_p7, %s1355_s8, %s63_s15  }
   0xd   : > { %p109_p10 = pnand %p1193_p6, %p108_p9 }
   0xe   : > { %p130_p11 = scmp.lt.s32.totalorder (!%p109_p10), %s1359_s9, 1  ;;  %s127_s25 = sand.u32 (!%p109_p10), 1, %s1351_s7  }
   0xf   : > { %112 = sbr.rel (%p109_p10) target bundleno = 202 (0xca), region = 24  ;;  %s1194_s26 = sshll.u32 (!%p109_p10), %s127_s25, 5 }
  0x10   : > { %s1761_s27 = scalar_lea.vmem (!%p109_p10), [#allocation2], %s1194_s26  ;;  %s1219_s28 = sshll.u32 (!%p109_p10), %s1359_s9, 5 }
  0x11   : > { %s1110_s2 = scalar_lea.hbm (!%p109_p10), %s1820_s1, %s1219_s28  ;;  %s1111_s3 = sshll.u32 (!%p109_p10), %s1761_s27, 4  ;;  %s1112_s3 = int_to_ptr.vmem [resolvable:$true] %s1111_s3 }
  0x12   : > { %s1113_s4 = sshll.u32 (!%p109_p10), %s1110_s2, 4  ;;  %s1098_s5 = scalar_lea.sflag (!%p109_p10), [#allocation3], %s127_s25  ;;  %s1114_s4 = int_to_ptr.hbm [resolvable:$true] %s1113_s4 }
  0x13   : > { %s1309_s17 = scalar_lea.hbm (!%p109_p10), %s1820_s1, 64 }
  0x14   : > { %v137_v0 = vlaneseq  ;;  %s131_s20 = scalar_select %p130_p11, %s1359_s9, 1  ;;  %v1369_v37 = vmov 683565275   ;;  %v1370_v39 = vmov 2475754826  }
  0x15   : > { %v1371_v41 = vmov 2131351028   ;;  %v1372_v43 = vmov 2102212464   ;;  %v1373_v45 = vmov 920167782  }
  0x16   : > { %v138_v1 = vshrl.u32 %v137_v0, 7  ;;  %s1195_s21 = sshll.u32 %s131_s20, 2  ;;  %v1374_v54 = vmov 1326507024   ;;  %s1303_s9 = sshra.s32 %s1114_s4, 4  ;;  %s1304_s9 = int_to_ptr.hbm [resolvable:$true] %s1303_s9 }
  0x17   : > { %s136_s24 = scalar_lea.vmem %s1819_s0, %s1195_s21  ;;  %s1305_s12 = scalar_lea.hbm %s1304_s9, 32 }
  0x18   : > { %v139_v2 = vcvt.s32.f32 %v138_v1  ;;  %v1284_v5 = vld [vmem:[%s136_s24] ss:$0 sm:$0xff]  ;;  %v1285_v6 = vld [vmem:[%s136_s24 + $0x1] ss:$0 sm:$0xff]  ;;  %v1286_v7 = vld [vmem:[%s136_s24 + $0x2] ss:$0 sm:$0xff]  ;;  %p1306_p12 = scmp.ne.s32.totalorder %s1304_s9, %s1305_s12  ;;  %p1310_p1 = scmp.lt.s32.totalorder %s1304_s9, %s1820_s1 }
  0x19   : > { %p1311_p2 = scmp.lt.s32.totalorder %s1309_s17, %s1305_s12 }
  0x1a   : > { %v140_v3 = vmul.f32 -1.5350567, %v139_v2  ;;  %p1307_p13 = pnand %p1306_p12, %p1428_p4 }
  0x1b   : > { %p1312_p3 = por %p1311_p2, %p1310_p1 }
  0x1c   : > { %v141_v4 = vmul.f32 1.442695, %v140_v3  ;;  %p1308_p0 = pneg %p1307_p13 }
  0x1e   : > { %1287 = vpow2.f32 %v141_v4  ;;  %p1313_p5 = pnand %p1312_p3, %p1308_p0 }
  0x24   : > { %v1288_v8 = vpop.eup %1287 }
  0x25   : > { %v1448_v9 = vmul.f32 %v1288_v8, %v1284_v5  ;;  %v1450_v10 = vmul.f32 %v1288_v8, %v1285_v6  ;;  %v1452_v11 = vmul.f32 %v1288_v8, %v1286_v7 }
  0x27   : > { %v146_v12 = vand.u32 2147483647, %v1448_v9  ;;  %v149_v13 = vand.u32 2139095040, %v1448_v9  ;;  %v465_v14 = vand.u32 2147483647, %v1450_v10  ;;  %v468_v15 = vand.u32 2139095040, %v1450_v10 }
  0x28   : > { %v786_v16 = vand.u32 2139095040, %v1452_v11 }
  0x29   : > { %v150_v17 = vshrl.u32 %v149_v13, 23  ;;  %v153_v18 = vand.u32 8388607, %v146_v12  ;;  %v469_v19 = vshrl.u32 %v468_v15, 23  ;;  %v472_v20 = vand.u32 8388607, %v465_v14 }
  0x2a   : > { %v787_v24 = vshrl.u32 %v786_v16, 23 }
  0x2b   : > { %v1196_v21 = vadd.s32 4294967169, %v150_v17  ;;  %v154_v22 = vor.u32 8388608, %v153_v18  ;;  %v1202_v23 = vadd.s32 4294967169, %v469_v19  ;;  %v473_v26 = vor.u32 8388608, %v472_v20 }
  0x2c   : > { %v1208_v30 = vadd.s32 4294967169, %v787_v24 }
  0x2d   : > { %v156_v25 = vadd.s32 1, %v1196_v21  ;;  %v475_v27 = vadd.s32 1, %v1202_v23  ;;  %v1463_v29 = vshll.u32 %v154_v22, 8  ;;  %v1469_v35 = vshll.u32 %v473_v26, 8 }
  0x2e   : > { %v1477_v48 = vadd.s32 1, %v1208_v30 }
  0x2f   : > { %vm157_vm0 = vcmp.gt.s32.totalorder %v156_v25, 0  ;;  %vm476_vm1 = vcmp.gt.s32.totalorder %v475_v27, 0  ;;  %v195_v47 = vand.u32 65535, %v1463_v29  ;;  %v196_v52 = vshrl.u32 %v1463_v29, 16 }
  0x30   : > { %v158_v28 = vsel %vm157_vm0, %v156_v25, 0  ;;  %v477_v32 = vsel %vm476_vm1, %v475_v27, 0  ;;  %vm794_vm15 = vcmp.gt.s32.totalorder %v1477_v48, 0 }
  0x31   : > { %v160_v31 = vand.u32 31, %v158_v28  ;;  %v1465_v33 = vshrl.u32 %v158_v28, 5  ;;  %v1467_v34 = vand.u32 31, %v477_v32  ;;  %v1497_v1 = vshrl.u32 %v477_v32, 5 }
  0x33   : > { %v161_v36 = vsub.s32 32, %v160_v31  ;;  %v163_v38 = vshll.u32 %v1369_v37, %v160_v31  ;;  %v166_v40 = vshll.u32 %v1370_v39, %v160_v31  ;;  %v169_v42 = vshll.u32 %v1371_v41, %v160_v31 }
  0x34   : > { %v172_v44 = vshll.u32 %v1372_v43, %v160_v31  ;;  %v175_v46 = vshll.u32 %v1373_v45, %v160_v31  ;;  %vm178_vm2 = vcmp.lt.s32.totalorder %v1465_v33, 1  ;;  %vm181_vm3 = vcmp.lt.s32.totalorder %v1465_v33, 4 }
  0x35   : > { %v164_v49 = vshrl.u32 %v1370_v39, %v161_v36  ;;  %v167_v50 = vshrl.u32 %v1371_v41, %v161_v36  ;;  %v170_v51 = vshrl.u32 %v1372_v43, %v161_v36  ;;  %v173_v53 = vshrl.u32 %v1373_v45, %v161_v36 }
  0x36   : > { %v176_v55 = vshrl.u32 %v1374_v54, %v161_v36  ;;  %v1488_v59 = vsub.s32 32, %v1467_v34  ;;  %v162_v60 = vshrl.u32 %v1369_v37, %v161_v36  ;;  %vm180_vm4 = vcmp.lt.s32.totalorder %v1465_v33, 3 }
  0x37   : > { %v165_v56 = vor.u32 %v164_v49, %v163_v38  ;;  %v168_v57 = vor.u32 %v167_v50, %v166_v40  ;;  %v171_v58 = vor.u32 %v170_v51, %v169_v42  ;;  %v174_v61 = vor.u32 %v173_v53, %v172_v44 }
  0x38   : > { %v177_v62 = vor.u32 %v176_v55, %v175_v46  ;;  %vm179_vm5 = vcmp.lt.s32.totalorder %v1465_v33, 2  ;;  %v482_v4 = vshll.u32 %v1369_v37, %v1467_v34  ;;  %v485_v5 = vshll.u32 %v1370_v39, %v1467_v34 }
  0x39   : > { %v186_v63 = vsel %vm178_vm2, %v165_v56, %v168_v57  ;;  %v190_v0 = vsel %vm178_vm2, %v168_v57, %v171_v58  ;;  %v187_v2 = vsel %vm181_vm3, %v174_v61, 920167782  ;;  %v183_v6 = vsel %vm181_vm3, %v171_v58, 2102212464 }
  0x3a   : > { %v191_v3 = vsel %vm181_vm3, %v177_v62, 1326507024  ;;  %v188_v7 = vsel %vm180_vm4, %v171_v58, %v187_v2  ;;  %v483_v13 = vshrl.u32 %v1370_v39, %v1488_v59  ;;  %v182_v15 = vsel %vm178_vm2, %v162_v60, %v165_v56 }
  0x3b   : > { %v192_v8 = vsel %vm180_vm4, %v174_v61, %v191_v3  ;;  %v189_v16 = vsel %vm179_vm5, %v186_v63, %v188_v7  ;;  %v486_v18 = vshrl.u32 %v1371_v41, %v1488_v59  ;;  %v184_v23 = vsel %vm180_vm4, %v168_v57, %v183_v6 }
  0x3c   : > { %v193_v17 = vsel %vm179_vm5, %v190_v0, %v192_v8  ;;  %v219_v21 = vand.u32 65535, %v189_v16  ;;  %v220_v22 = vshrl.u32 %v189_v16, 16  ;;  %v1525_v24 = vor.u32 %v483_v13, %v482_v4 }
  0x3d   : > { %v197_v19 = vand.u32 65535, %v193_v17  ;;  %v198_v20 = vshrl.u32 %v193_v17, 16  ;;  %v1527_v25 = vor.u32 %v486_v18, %v485_v5  ;;  %v488_v26 = vshll.u32 %v1371_v41, %v1467_v34 }
  0x3e   : > { %v489_v31 = vshrl.u32 %v1372_v43, %v1488_v59  ;;  %v221_v36 = vmul.u32 %v219_v21, %v195_v47  ;;  %v222_v38 = vmul.u32 %v220_v22, %v195_v47  ;;  %v223_v40 = vmul.u32 %v219_v21, %v196_v52 }
  0x3f   : > { %v199_v27 = vmul.u32 %v197_v19, %v195_v47  ;;  %v200_v28 = vmul.u32 %v198_v20, %v195_v47  ;;  %v201_v30 = vmul.u32 %v197_v19, %v196_v52  ;;  %v202_v32 = vmul.u32 %v198_v20, %v196_v52 }
  0x40   : > { %v224_v49 = vmul.u32 %v220_v22, %v196_v52  ;;  %v225_v51 = vshll.u32 %v222_v38, 16  ;;  %v226_v53 = vshrl.u32 %v222_v38, 16  ;;  %v227_v55 = vshll.u32 %v223_v40, 16 }
  0x41   : > { %v203_v42 = vshll.u32 %v200_v28, 16  ;;  %v204_v44 = vshrl.u32 %v200_v28, 16  ;;  %v205_v46 = vshll.u32 %v201_v30, 16  ;;  %v206_v50 = vshrl.u32 %v201_v30, 16 }
  0x42   : > { %v228_v57 = vshrl.u32 %v223_v40, 16  ;;  %v491_v58 = vshll.u32 %v1372_v43, %v1467_v34  ;;  %v1375_v60 = vmov 0   ;;  %vm229_vm7 = vc.u32 %v221_v36, %v225_v51 }
  0x43   : > { %vm207_vm6 = vc.u32 %v199_v27, %v203_v42  ;;  %v209_v56 = vadd.s32 %v203_v42, %v199_v27  ;;  %v231_v47 = vadd.s32 %v225_v51, %v221_v36  ;;  %v492_v62 = vshrl.u32 %v1373_v45, %v1488_v59 }
  0x44   : > { %v208_v61 = vsel %vm207_vm6, 1, %v1375_v60  ;;  %v230_v52 = vsel %vm229_vm7, 1, %v1375_v60  ;;  %v494_v0 = vshll.u32 %v1373_v45, %v1467_v34  ;;  %v490_v4 = vor.u32 %v489_v31, %v488_v26 }
  0x45   : > { %v210_v63 = vadd.s32 %v208_v61, %v202_v32  ;;  %vm211_vm8 = vc.u32 %v209_v56, %v205_v46  ;;  %v232_v3 = vadd.s32 %v230_v52, %v224_v49  ;;  %vm233_vm9 = vc.u32 %v231_v47, %v227_v55 }
  0x46   : > { %v212_v2 = vsel %vm211_vm8, 1, %v1375_v60  ;;  %v234_v6 = vsel %vm233_vm9, 1, %v1375_v60  ;;  %v493_v7 = vor.u32 %v492_v62, %v491_v58  ;;  %v495_v8 = vshrl.u32 %v1374_v54, %v1488_v59 }
  0x47   : > { %v214_v5 = vadd.s32 %v212_v2, %v210_v63  ;;  %v1545_v13 = vadd.s32 %v231_v47, %v227_v55  ;;  %v236_v16 = vadd.s32 %v234_v6, %v232_v3  ;;  %vm497_vm10 = vcmp.lt.s32.totalorder %v1497_v1, 1 }
  0x48   : > { %vm499_vm11 = vcmp.lt.s32.totalorder %v1497_v1, 3  ;;  %v496_v17 = vor.u32 %v495_v8, %v494_v0  ;;  %vm498_vm12 = vcmp.lt.s32.totalorder %v1497_v1, 2  ;;  %vm500_vm13 = vcmp.lt.s32.totalorder %v1497_v1, 4 }
  0x49   : > { %v215_v34 = vadd.s32 %v214_v5, %v204_v44  ;;  %v185_v18 = vsel %vm179_vm5, %v182_v15, %v184_v23  ;;  %v237_v19 = vadd.s32 %v236_v16, %v226_v53  ;;  %v505_v20 = vsel %vm497_vm10, %v1525_v24, %v1527_v25 }
  0x4a   : > { %v506_v21 = vsel %vm500_vm13, %v493_v7, 920167782  ;;  %v509_v27 = vsel %vm497_vm10, %v1527_v25, %v490_v4  ;;  %v514_v33 = vand.u32 65535, %v1469_v35  ;;  %v510_v28 = vsel %vm500_vm13, %v496_v17, 1326507024 }
  0x4b   : > { %v1559_v22 = vadd.s32 %v215_v34, %v206_v50  ;;  %v507_v26 = vsel %vm499_vm11, %v490_v4, %v506_v21  ;;  %v238_v15 = vadd.s32 %v237_v19, %v228_v57  ;;  %v515_v30 = vshrl.u32 %v1469_v35, 16 }
  0x4c   : > { %v508_v23 = vsel %vm498_vm12, %v505_v20, %v507_v26  ;;  %v239_v31 = vmul.u32 %v1463_v29, %v185_v18  ;;  %v511_v32 = vsel %vm499_vm11, %v493_v7, %v510_v28  ;;  %v481_v29 = vshrl.u32 %v1369_v37, %v1488_v59 }
  0x4d   : > { %vm241_vm14 = vc.u32 %v1559_v22, %v1545_v13  ;;  %v538_v36 = vand.u32 65535, %v508_v23  ;;  %v242_v38 = vadd.s32 1, %v238_v15  ;;  %v512_v40 = vsel %vm498_vm12, %v509_v27, %v511_v32 }
  0x4e   : > { %v539_v42 = vshrl.u32 %v508_v23, 16  ;;  %v516_v44 = vand.u32 65535, %v512_v40  ;;  %v517_v46 = vshrl.u32 %v512_v40, 16  ;;  %v795_v47 = vsel %vm794_vm15, %v1477_v48, 0 }
  0x4f   : > { %v243_v49 = vsel %vm241_vm14, %v242_v38, %v238_v15  ;;  %v542_v51 = vmul.u32 %v538_v36, %v515_v30  ;;  %v540_v57 = vmul.u32 %v538_v36, %v514_v33  ;;  %v502_v63 = vsel %vm500_vm13, %v490_v4, 2102212464 }
  0x50   : > { %v541_v50 = vmul.u32 %v539_v42, %v514_v33  ;;  %v244_v53 = vadd.s32 %v243_v49, %v239_v31  ;;  %v518_v55 = vmul.u32 %v516_v44, %v514_v33  ;;  %v519_v56 = vmul.u32 %v517_v46, %v514_v33 }
  0x51   : > { %v520_v58 = vmul.u32 %v516_v44, %v515_v30  ;;  %v521_v52 = vmul.u32 %v517_v46, %v515_v30  ;;  %v501_v59 = vsel %vm497_vm10, %v481_v29, %v1525_v24  ;;  %v543_v3 = vmul.u32 %v539_v42, %v515_v30 }
  0x52   : > { %v544_v61 = vshll.u32 %v541_v50, 16  ;;  %v245_v62 = vadd.s32 536870912, %v244_v53  ;;  %v522_v0 = vshll.u32 %v519_v56, 16  ;;  %v546_v5 = vshll.u32 %v542_v51, 16 }
  0x53   : > { %v524_v2 = vshll.u32 %v520_v58, 16  ;;  %v503_v48 = vsel %vm499_vm11, %v1527_v25, %v502_v63  ;;  %v523_v17 = vshrl.u32 %v519_v56, 16  ;;  %v545_v19 = vshrl.u32 %v541_v50, 16 }
  0x54   : > { %v246_v6 = vshrl.u32 %v245_v62, 30  ;;  %vm526_vm0 = vc.u32 %v518_v55, %v522_v0  ;;  %v528_v7 = vadd.s32 %v522_v0, %v518_v55  ;;  %vm548_vm1 = vc.u32 %v540_v57, %v544_v61 }
  0x55   : > { %v527_v8 = vsel %vm526_vm0, 1, %v1375_v60  ;;  %v549_v4 = vsel %vm548_vm1, 1, %v1375_v60  ;;  %v550_v16 = vadd.s32 %v544_v61, %v540_v57  ;;  %v525_v26 = vshrl.u32 %v520_v58, 16 }
  0x56   : > { %v247_v34 = vshll.u32 %v246_v6, 30  ;;  %v529_v18 = vadd.s32 %v527_v8, %v521_v52  ;;  %vm530_vm2 = vc.u32 %v528_v7, %v524_v2  ;;  %v551_v20 = vadd.s32 %v549_v4, %v543_v3 }
  0x57   : > { %v531_v24 = vsel %vm530_vm2, 1, %v1375_v60  ;;  %vm552_vm3 = vc.u32 %v550_v16, %v546_v5  ;;  %v547_v25 = vshrl.u32 %v542_v51, 16  ;;  %v797_v23 = vand.u32 31, %v795_v47 }
  0x58   : > { %v248_v21 = vsub.s32 %v244_v53, %v247_v34  ;;  %v533_v27 = vadd.s32 %v531_v24, %v529_v18  ;;  %v553_v33 = vsel %vm552_vm3, 1, %v1375_v60  ;;  %v1595_v31 = vadd.s32 %v550_v16, %v546_v5 }
  0x59   : > { %v555_v15 = vadd.s32 %v553_v33, %v551_v20  ;;  %v504_v32 = vsel %vm498_vm12, %v501_v59, %v503_v48  ;;  %v798_v46 = vsub.s32 32, %v797_v23  ;;  %v783_v51 = vand.u32 2147483647, %v1452_v11 }
  0x5a   : > { %vm249_vm4 = vcmp.lt.s32.totalorder %v248_v21, 0  ;;  %v250_v28 = vsub.s32 0, %v248_v21  ;;  %v534_v30 = vadd.s32 %v533_v27, %v523_v17  ;;  %v558_v49 = vmul.u32 %v1469_v35, %v504_v32 }
  0x5b   : > { %v556_v36 = vadd.s32 %v555_v15, %v545_v19  ;;  %v240_v1 = vadd.s32 %v1545_v13, %v1559_v22  ;;  %v270_v53 = vsub.s32 4, %v246_v6  ;;  %v1607_v55 = vshrl.u32 %v795_v47, 5 }
  0x5c   : > { %v251_v38 = vsel %vm249_vm4, %v250_v28, %v248_v21  ;;  %v1599_v40 = vadd.s32 %v534_v30, %v525_v26  ;;  %v803_v56 = vshll.u32 %v1370_v39, %v797_v23  ;;  %v804_v58 = vshrl.u32 %v1371_v41, %v798_v46 }
  0x5d   : > { %v252_v42 = vclz %v251_v38  ;;  %v557_v44 = vadd.s32 %v556_v36, %v547_v25  ;;  %v806_v35 = vshll.u32 %v1371_v41, %v797_v23  ;;  %v807_v63 = vshrl.u32 %v1372_v43, %v798_v46 }
  0x5e   : > { %vm560_vm5 = vc.u32 %v1599_v40, %v1595_v31  ;;  %v812_v52 = vshll.u32 %v1373_v45, %v797_v23  ;;  %v813_v22 = vshrl.u32 %v1374_v54, %v798_v46  ;;  %vm1617_vm7 = vcmp.le.f32.partialorder %v146_v12, 0.7853982 }
  0x5f   : > { %v1197_v29 = vadd.s32 4294967294, %v252_v42  ;;  %v561_v50 = vadd.s32 1, %v557_v44  ;;  %vm148_vm8 = vcmp.lt.s32.totalorder %v1448_v9, 0  ;;  %v790_v2 = vand.u32 8388607, %v783_v51 }
  0x60   : > { %v271_v7 = vsel %vm148_vm8, %v270_v53, %v246_v6  ;;  %v805_v48 = vor.u32 %v804_v58, %v803_v56  ;;  %v808_v54 = vor.u32 %v807_v63, %v806_v35  ;;  %v809_v12 = vshll.u32 %v1372_v43, %v797_v23 }
  0x61   : > { %vm1198_vm6 = vcmp.lt.s32.totalorder %v1197_v29, 0  ;;  %v562_v57 = vsel %vm560_vm5, %v561_v50, %v557_v44  ;;  %v810_v4 = vshrl.u32 %v1373_v45, %v798_v46  ;;  %v814_v17 = vor.u32 %v813_v22, %v812_v52 }
  0x62   : > { %v255_v61 = vsel %vm1198_vm6, 0, %v1197_v29  ;;  %v563_v62 = vadd.s32 %v562_v57, %v558_v49  ;;  %vm815_vm9 = vcmp.lt.s32.totalorder %v1607_v55, 1  ;;  %v800_v24 = vshll.u32 %v1369_v37, %v797_v23 }
  0x63   : > { %v256_v0 = vsub.s32 32, %v255_v61  ;;  %v257_v59 = vshll.u32 %v248_v21, %v255_v61  ;;  %v260_v13 = vsub.s32 4294967266, %v255_v61  ;;  %v801_v19 = vshrl.u32 %v1370_v39, %v798_v46 }
  0x64   : > { %v564_v41 = vadd.s32 536870912, %v563_v62  ;;  %vm818_vm10 = vcmp.lt.s32.totalorder %v1607_v55, 4  ;;  %v791_v21 = vor.u32 8388608, %v790_v2  ;;  %vm817_vm11 = vcmp.lt.s32.totalorder %v1607_v55, 3 }
  0x65   : > { %v258_v3 = vshrl.u32 %v240_v1, %v256_v0  ;;  %v261_v5 = vadd.s32 127, %v260_v13  ;;  %v811_v45 = vor.u32 %v810_v4, %v809_v12  ;;  %vm816_vm12 = vcmp.lt.s32.totalorder %v1607_v55, 2 }
  0x66   : > { %v1626_v8 = vshrl.u32 %v564_v41, 30  ;;  %v827_v26 = vsel %vm815_vm9, %v805_v48, %v808_v54  ;;  %v273_v33 = vsel %vm1617_vm7, 0, %v271_v7  ;;  %v828_v39 = vsel %vm818_vm10, %v814_v17, 1326507024 }
  0x67   : > { %v259_v16 = vor.u32 %v258_v3, %v257_v59  ;;  %v262_v34 = vshll.u32 %v261_v5, 23  ;;  %v802_v15 = vor.u32 %v801_v19, %v800_v24  ;;  %v829_v23 = vsel %vm817_vm11, %v811_v45, %v828_v39 }
  0x68   : > { %v566_v18 = vshll.u32 %v1626_v8, 30  ;;  %v799_v30 = vshrl.u32 %v1369_v37, %v798_v46  ;;  %v830_v32 = vsel %vm816_vm12, %v827_v26, %v829_v23  ;;  %v1652_v36 = vshll.u32 %v791_v21, 8 }
  0x69   : > { %v263_v6 = vor.u32 4788187, %v262_v34  ;;  %v266_v20 = vcvt.s32.f32 %v259_v16  ;;  %v290_v38 = vadd.s32 3, %v273_v33  ;;  %v824_v44 = vsel %vm818_vm10, %v811_v45, 920167782 }
  0x6a   : > { %v1636_v43 = vsub.s32 %v563_v62, %v566_v18  ;;  %v835_v49 = vshrl.u32 %v830_v32, 16  ;;  %v832_v1 = vand.u32 65535, %v1652_v36  ;;  %v834_v53 = vand.u32 65535, %v830_v32 }
  0x6b   : > { %v264_v27 = vand.u32 2147483647, %v263_v6  ;;  %v559_v37 = vadd.s32 %v1595_v31, %v1599_v40  ;;  %v820_v46 = vsel %vm818_vm10, %v808_v54, 2102212464  ;;  %v823_v56 = vsel %vm815_vm9, %v802_v15, %v805_v48 }
  0x6c   : > { %vm568_vm13 = vcmp.lt.s32.totalorder %v1636_v43, 0  ;;  %v569_v25 = vsub.s32 0, %v1636_v43  ;;  %v833_v57 = vshrl.u32 %v1652_v36, 16  ;;  %v825_v61 = vsel %vm817_vm11, %v808_v54, %v824_v44 }
  0x6d   : > { %v267_v28 = vmul.f32 %v266_v20, %v264_v27  ;;  %v1669_v62 = vmul.u32 %v835_v49, %v832_v1  ;;  %v1676_v40 = vand.u32 3, %v290_v38  ;;  %v1678_v63 = vand.u32 3, %v273_v33 }
  0x6e   : > { %v570_v42 = vsel %vm568_vm13, %v569_v25, %v1636_v43  ;;  %v819_v52 = vsel %vm815_vm9, %v799_v30, %v802_v15  ;;  %v836_v59 = vmul.u32 %v834_v53, %v832_v1  ;;  %v821_v47 = vsel %vm817_vm11, %v805_v48, %v820_v46 }
  0x6f   : > { %v268_v29 = vxor.u32 2147483648, %v267_v28  ;;  %v571_v50 = vclz %v570_v42  ;;  %v840_v13 = vshll.u32 %v1669_v62, 16  ;;  %v826_v41 = vsel %vm816_vm12, %v823_v56, %v825_v61 }
  0x70   : > { %v1689_v2 = vmul.u32 %v834_v53, %v833_v57  ;;  %v856_v4 = vand.u32 65535, %v826_v41  ;;  %vm467_vm15 = vcmp.lt.s32.totalorder %v1450_v10, 0  ;;  %vm296_vm1 = vcmp.eq.s32.totalorder %v1676_v40, 2 }
  0x71   : > { %v269_v58 = vsel %vm148_vm8, %v268_v29, %v267_v28  ;;  %v1203_v35 = vadd.s32 4294967294, %v571_v50  ;;  %vm1693_vm0 = vc.u32 %v836_v59, %v840_v13  ;;  %vm450_vm2 = vcmp.eq.s32.totalorder %v1678_v63, 2 }
  0x72   : > { %v1674_v31 = vsel %vm1617_vm7, %v1448_v9, %v269_v58  ;;  %v1701_v24 = vsel %vm816_vm12, %v819_v52, %v821_v47  ;;  %v839_v19 = vmul.u32 %v835_v49, %v833_v57  ;;  %v857_v6 = vshrl.u32 %v826_v41, 16 }
  0x73   : > { %v274_v0 = vmul.f32 %v1674_v31, %v1674_v31  ;;  %vm1204_vm14 = vcmp.lt.s32.totalorder %v1203_v35, 0  ;;  %v842_v45 = vshll.u32 %v1689_v2, 16  ;;  %vm293_vm3 = vcmp.eq.s32.totalorder %v1676_v40, 0 }
  0x74   : > { %v574_v22 = vsel %vm1204_vm14, 0, %v1203_v35  ;;  %vm447_vm4 = vcmp.eq.s32.totalorder %v1678_v63, 0  ;;  %vm1708_vm5 = vcmp.le.f32.partialorder %v465_v14, 0.7853982  ;;  %v589_v27 = vsub.s32 4, %v1626_v8 }
  0x75   : > { %v275_v3 = vmul.f32 -0.001358992, %v274_v0  ;;  %v282_v5 = vmul.f32 -0.00019511016, %v274_v0  ;;  %v575_v7 = vsub.s32 32, %v574_v22  ;;  %v576_v54 = vshll.u32 %v1636_v43, %v574_v22 }
  0x76   : > { %v579_v12 = vsub.s32 4294967266, %v574_v22  ;;  %v845_v33 = vsel %vm1693_vm0, 1, %v1375_v60  ;;  %v858_v39 = vmul.u32 %v856_v4, %v832_v1  ;;  %vm292_vm6 = vcmp.lt.s32.totalorder %v1676_v40, 2 }
  0x77   : > { %v276_v16 = vadd.f32 0.041655596, %v275_v3  ;;  %v283_v34 = vadd.f32 0.008332121, %v282_v5  ;;  %v577_v17 = vshrl.u32 %v559_v37, %v575_v7  ;;  %vm446_vm7 = vcmp.lt.s32.totalorder %v1678_v63, 2 }
  0x78   : > { %v580_v48 = vadd.s32 127, %v579_v12  ;;  %v846_v28 = vadd.s32 %v840_v13, %v836_v59  ;;  %vm289_vm8 = vweird.f32 %v1448_v9  ;;  %v847_v30 = vadd.s32 %v845_v33, %v839_v19 }
  0x79   : > { %v277_v20 = vmul.f32 %v276_v16, %v274_v0  ;;  %v284_v21 = vmul.f32 %v283_v34, %v274_v0  ;;  %v578_v43 = vor.u32 %v577_v17, %v576_v54  ;;  %v859_v32 = vmul.u32 %v857_v6, %v832_v1 }
  0x7a   : > { %v581_v55 = vshll.u32 %v580_v48, 23  ;;  %v860_v38 = vmul.u32 %v856_v4, %v833_v57  ;;  %v841_v49 = vshrl.u32 %v1669_v62, 16  ;;  %vm848_vm9 = vc.u32 %v846_v28, %v842_v45 }
  0x7b   : > { %v278_v25 = vadd.f32 -0.4999988, %v277_v20  ;;  %v285_v15 = vadd.f32 -0.16666654, %v284_v21  ;;  %v585_v23 = vcvt.s32.f32 %v578_v43  ;;  %v849_v50 = vsel %vm848_vm9, 1, %v1375_v60 }
  0x7c   : > { %v582_v14 = vor.u32 4788187, %v581_v55  ;;  %v861_v53 = vmul.u32 %v857_v6, %v833_v57  ;;  %v862_v37 = vshll.u32 %v859_v32, 16  ;;  %v851_v58 = vadd.s32 %v849_v50, %v847_v30 }
  0x7d   : > { %v279_v42 = vmul.f32 %v278_v25, %v274_v0  ;;  %v286_v44 = vmul.f32 %v285_v15, %v274_v0  ;;  %v864_v35 = vshll.u32 %v860_v38, 16  ;;  %v590_v1 = vsel %vm467_vm15, %v589_v27, %v1626_v8 }
  0x7e   : > { %v583_v29 = vand.u32 2147483647, %v582_v14  ;;  %vm866_vm10 = vc.u32 %v858_v39, %v862_v37  ;;  %v868_v52 = vadd.s32 %v862_v37, %v858_v39  ;;  %v843_v59 = vshrl.u32 %v1689_v2, 16 }
  0x7f   : > { %v280_v46 = vadd.f32 1.0, %v279_v42  ;;  %v287_v56 = vadd.f32 1.0, %v286_v44  ;;  %v867_v57 = vsel %vm866_vm10, 1, %v1375_v60  ;;  %v852_v22 = vadd.s32 %v851_v58, %v841_v49 }
  0x80   : > { %v586_v61 = vmul.f32 %v585_v23, %v583_v29  ;;  %v869_v47 = vadd.s32 %v867_v57, %v861_v53  ;;  %vm870_vm11 = vc.u32 %v868_v52, %v864_v35  ;;  %v863_v5 = vshrl.u32 %v859_v32, 16 }
  0x81   : > { %v288_v62 = vmul.f32 %v287_v56, %v1674_v31  ;;  %v297_v0 = vxor.u32 2147483648, %v280_v46  ;;  %v865_v2 = vshrl.u32 %v860_v38, 16  ;;  %v871_v7 = vsel %vm870_vm11, 1, %v1375_v60 }
  0x82   : > { %v587_v13 = vxor.u32 2147483648, %v586_v61  ;;  %v1737_v54 = vadd.s32 %v868_v52, %v864_v35  ;;  %v873_v34 = vadd.s32 %v871_v7, %v869_v47  ;;  %v1750_v48 = vadd.s32 %v852_v22, %v843_v59 }
  0x83   : > { %v294_v41 = vxor.u32 2147483648, %v288_v62  ;;  %v298_v3 = vsel %vm296_vm1, %v297_v0, %v288_v62  ;;  %v452_v8 = vsel %vm450_vm2, %v297_v0, %v288_v62  ;;  %vm458_vm12 = vcmask 1045504  }
  0x84   : > { %v588_v31 = vsel %vm467_vm15, %v587_v13, %v586_v61  ;;  %v874_v20 = vadd.s32 %v873_v34, %v863_v5  ;;  %v592_v43 = vsel %vm1708_vm5, 0, %v590_v1  ;;  %v876_v63 = vmul.u32 %v1652_v36, %v1701_v24 }
  0x85   : > { %v295_v12 = vsel %vm293_vm3, %v280_v46, %v294_v41  ;;  %v449_v4 = vsel %vm447_vm4, %v280_v46, %v294_v41  ;;  %v591_v16 = vsel %vm1708_vm5, %v1450_v10, %v588_v31  ;;  %vm878_vm13 = vc.u32 %v1750_v48, %v1737_v54 }
  0x86   : > { %v299_v17 = vsel %vm292_vm6, %v295_v12, %v298_v3  ;;  %v453_v18 = vsel %vm446_vm7, %v449_v4, %v452_v8  ;;  %v593_v60 = vmul.f32 %v591_v16, %v591_v16  ;;  %v875_v55 = vadd.s32 %v874_v20, %v865_v2 }
  0x87   : > { %v300_v19 = vsel %vm289_vm8, nan, %v299_v17  ;;  %v454_v6 = vsel %vm289_vm8, nan, %v453_v18  ;;  %v609_v26 = vadd.s32 3, %v592_v43  ;;  %v764_v30 = vand.u32 3, %v592_v43 }
  0x88   : > { %v456_v21 = vrot.slane %v454_v6, 2  ;;  %v594_v40 = vmul.f32 -0.001358992, %v593_v60  ;;  %v601_v45 = vmul.f32 -0.00019511016, %v593_v60  ;;  %v879_v39 = vadd.s32 1, %v875_v55 }
  0x89   : > { %v610_v14 = vand.u32 3, %v609_v26  ;;  %vm769_vm15 = vcmp.eq.s32.totalorder %v764_v30, 2  ;;  %vm765_vm2 = vcmp.lt.s32.totalorder %v764_v30, 2  ;;  %vm766_vm3 = vcmp.eq.s32.totalorder %v764_v30, 0 }
  0x8a   : > { %v459_v27 = vsel %vm458_vm12, %v300_v19, %v456_v21  ;;  %461 = vst [vmem:[%s1761_s27 + $0x8] sm:$0xf] %v456_v21  ;;  %v595_v9 = vadd.f32 0.041655596, %v594_v40  ;;  %v602_v33 = vadd.f32 0.008332121, %v601_v45  ;;  %v880_v23 = vsel %vm878_vm13, %v879_v39, %v875_v55 }
  0x8b   : > { %460 = vst [vmem:[%s1761_s27] sm:$0xff] %v459_v27  ;;  %v881_v24 = vadd.s32 %v880_v23, %v876_v63  ;;  %vm615_vm14 = vcmp.eq.s32.totalorder %v610_v14, 2  ;;  %vm611_vm0 = vcmp.lt.s32.totalorder %v610_v14, 2  ;;  %vm612_vm1 = vcmp.eq.s32.totalorder %v610_v14, 0 }
  0x8c   : > { %v596_v25 = vmul.f32 %v595_v9, %v593_v60  ;;  %v603_v15 = vmul.f32 %v602_v33, %v593_v60  ;;  %vm608_vm4 = vweird.f32 %v1450_v10  ;;  %v877_v8 = vadd.s32 %v1737_v54, %v1750_v48 }
  0x8d   : > { %v882_v42 = vadd.s32 536870912, %v881_v24  ;;  %vm785_vm7 = vcmp.lt.s32.totalorder %v1452_v11, 0  ;;  %vm784_vm8 = vcmp.le.f32.partialorder %v783_v51, 0.7853982 }
  0x8e   : > { %v597_v28 = vadd.f32 -0.4999988, %v596_v25  ;;  %v604_v36 = vadd.f32 -0.16666654, %v603_v15 }
  0x8f   : > { %v883_v29 = vshrl.u32 %v882_v42, 30 }
  0x90   : > { %v598_v32 = vmul.f32 %v597_v28, %v593_v60  ;;  %v605_v38 = vmul.f32 %v604_v36, %v593_v60 }
  0x91   : > { %v884_v37 = vshll.u32 %v883_v29, 30  ;;  %v907_v19 = vsub.s32 4, %v883_v29 }
  0x92   : > { %v599_v44 = vadd.f32 1.0, %v598_v32  ;;  %v606_v49 = vadd.f32 1.0, %v605_v38 }
  0x93   : > { %v885_v35 = vsub.s32 %v881_v24, %v884_v37  ;;  %v908_v6 = vsel %vm785_vm7, %v907_v19, %v883_v29 }
  0x94   : > { %v607_v50 = vmul.f32 %v606_v49, %v591_v16  ;;  %v616_v53 = vxor.u32 2147483648, %v599_v44  ;;  %v910_v43 = vsel %vm784_vm8, 0, %v908_v6 }
  0x95   : > { %vm886_vm5 = vcmp.lt.s32.totalorder %v885_v35, 0  ;;  %v887_v52 = vsub.s32 0, %v885_v35  ;;  %v927_v27 = vadd.s32 3, %v910_v43  ;;  %v1082_v15 = vand.u32 3, %v910_v43 }
  0x96   : > { %v613_v46 = vxor.u32 2147483648, %v607_v50  ;;  %v617_v56 = vsel %vm615_vm14, %v616_v53, %v607_v50  ;;  %v771_v58 = vsel %vm769_vm15, %v616_v53, %v607_v50 }
  0x97   : > { %v888_v13 = vsel %vm886_vm5, %v887_v52, %v885_v35  ;;  %v928_v25 = vand.u32 3, %v927_v27  ;;  %vm1087_vm10 = vcmp.eq.s32.totalorder %v1082_v15, 2  ;;  %vm1084_vm14 = vcmp.eq.s32.totalorder %v1082_v15, 0 }
  0x98   : > { %v614_v61 = vsel %vm612_vm1, %v599_v44, %v613_v46  ;;  %v768_v1 = vsel %vm766_vm3, %v599_v44, %v613_v46  ;;  %v889_v47 = vclz %v888_v13  ;;  %vm1083_vm15 = vcmp.lt.s32.totalorder %v1082_v15, 2 }
  0x99   : > { %v618_v62 = vsel %vm611_vm0, %v614_v61, %v617_v56  ;;  %v772_v0 = vsel %vm765_vm2, %v768_v1, %v771_v58  ;;  %vm933_vm9 = vcmp.eq.s32.totalorder %v928_v25, 2  ;;  %vm929_vm11 = vcmp.lt.s32.totalorder %v928_v25, 2 }
  0x9a   : > { %v619_v59 = vsel %vm608_vm4, nan, %v618_v62  ;;  %v773_v57 = vsel %vm608_vm4, nan, %v772_v0  ;;  %v1209_v3 = vadd.s32 4294967294, %v889_v47  ;;  %vm930_vm13 = vcmp.eq.s32.totalorder %v928_v25, 0 }
  0x9b   : > { %v775_v22 = vrot.slane %v773_v57, 2  ;;  %vm926_vm0 = vweird.f32 %v1452_v11 }
  0x9c   : > { %vm1210_vm6 = vcmp.lt.s32.totalorder %v1209_v3, 0 }
  0x9d   : > { %v777_v41 = vsel %vm458_vm12, %v619_v59, %v775_v22  ;;  %779 = vst [vmem:[%s1761_s27 + $0x14] sm:$0xf] %v775_v22  ;;  %v892_v10 = vsel %vm1210_vm6, 0, %v1209_v3 }
  0x9e   : > { %778 = vst [vmem:[%s1761_s27 + $0xc] sm:$0xff] %v777_v41  ;;  %v893_v5 = vsub.s32 32, %v892_v10  ;;  %v894_v31 = vshll.u32 %v885_v35, %v892_v10  ;;  %v897_v2 = vsub.s32 4294967266, %v892_v10 }
  0xa0   : > { %v895_v7 = vshrl.u32 %v877_v8, %v893_v5  ;;  %v898_v12 = vadd.s32 127, %v897_v2 }
  0xa2   : > { %v896_v4 = vor.u32 %v895_v7, %v894_v31  ;;  %v899_v16 = vshll.u32 %v898_v12, 23 }
  0xa4   : > { %v900_v34 = vor.u32 4788187, %v899_v16  ;;  %v903_v17 = vcvt.s32.f32 %v896_v4 }
  0xa6   : > { %v901_v18 = vand.u32 2147483647, %v900_v34 }
  0xa8   : > { %v904_v60 = vmul.f32 %v903_v17, %v901_v18 }
  0xaa   : > { %v905_v54 = vxor.u32 2147483648, %v904_v60 }
  0xac   : > { %v906_v48 = vsel %vm785_vm7, %v905_v54, %v904_v60 }
  0xad   : > { %v909_v20 = vsel %vm784_vm8, %v1452_v11, %v906_v48 }
  0xae   : > { %v911_v21 = vmul.f32 %v909_v20, %v909_v20 }
  0xb0   : > { %v912_v40 = vmul.f32 -0.001358992, %v911_v21  ;;  %v919_v45 = vmul.f32 -0.00019511016, %v911_v21 }
  0xb2   : > { %v913_v55 = vadd.f32 0.041655596, %v912_v40  ;;  %v920_v63 = vadd.f32 0.008332121, %v919_v45 }
  0xb4   : > { %v914_v9 = vmul.f32 %v913_v55, %v911_v21  ;;  %v921_v33 = vmul.f32 %v920_v63, %v911_v21 }
  0xb6   : > { %v915_v26 = vadd.f32 -0.4999988, %v914_v9  ;;  %v922_v39 = vadd.f32 -0.16666654, %v921_v33 }
  0xb8   : > { %v916_v51 = vmul.f32 %v915_v26, %v911_v21  ;;  %v923_v23 = vmul.f32 %v922_v39, %v911_v21 }
  0xba   : > { %v917_v28 = vadd.f32 1.0, %v916_v51  ;;  %v924_v36 = vadd.f32 1.0, %v923_v23 }
  0xbc   : > { %v925_v24 = vmul.f32 %v924_v36, %v909_v20  ;;  %v934_v14 = vxor.u32 2147483648, %v917_v28 }
  0xbe   : > { %v931_v30 = vxor.u32 2147483648, %v925_v24  ;;  %v935_v32 = vsel %vm933_vm9, %v934_v14, %v925_v24  ;;  %v1089_v38 = vsel %vm1087_vm10, %v934_v14, %v925_v24 }
  0xc0   : > { %v932_v42 = vsel %vm930_vm13, %v917_v28, %v931_v30  ;;  %v1086_v44 = vsel %vm1084_vm14, %v917_v28, %v931_v30 }
  0xc1   : > { %v936_v49 = vsel %vm929_vm11, %v932_v42, %v935_v32  ;;  %v1090_v29 = vsel %vm1083_vm15, %v1086_v44, %v1089_v38 }
  0xc2   : > { %v937_v50 = vsel %vm926_vm0, nan, %v936_v49  ;;  %v1091_v53 = vsel %vm926_vm0, nan, %v1090_v29 }
  0xc3   : > { %v1093_v37 = vrot.slane %v1091_v53, 2 }
  0xc5   : > { %v1095_v46 = vsel %vm458_vm12, %v937_v50, %v1093_v37 }
  0xc6   : > { %1096 = vst [vmem:[%s1761_s27 + $0x18] sm:$0xff] %v1095_v46 }
  0xc7   : > { %1316 = shalt.err (!%p1313_p5)
}
  0xc8   : > { %s1376_s22 = smov 128   ;;  %s1377_s23 = smov 8  }
  0xc9   : > { %1220 = dma.vmem_to_hbm [thread:$0]  (%p1428_p4), %s1112_s3, 512, %s1114_s4, %s1098_s5, %s1376_s22, %s1376_s22, %s1377_s23  }
  0xca PF: > { %p1226_p6 = scmp.ge.s32.totalorder %s1367_s11, 2  ;;  %s1128_s24 = sand.u32 1, %s1347_s6  }
  0xcb   : > { %s1129_s25 = scalar_lea.sflag [#allocation3], %s1128_s24 }
  0xcc   : > { %p1223_p7 = pnand %p1226_p6, %p1435_p8 }
  0xce   : > { %p1224_p9 = pneg %p1223_p7 }
  0xd0   : > { %1342 = dma.done.wait (%p1224_p9), %s1129_s25, 512  }
  0xd1   : > { %1344 = vsyncadd (%p1224_p9), %s1129_s25, 4294966784  ;;  %s14_s11 = sadd.s32 1, %s1367_s11   ;;  %s1829_s6 = smov %s1351_s7 }
  0xd2   : > { %p11_p10 = scmp.ge.s32.totalorder %s14_s11, 4   ;;  %s1830_s7 = smov %s1355_s8 }
  0xd3   : > { %s1831_s8 = smov %s1441_s19  ;;  %s1832_s9 = smov %s1363_s10 }
  0xd4   : > { %s1833_s10 = smov %s1835_s14  ;;  %13 = sbr.rel (!%p11_p10) target bundleno = 4 (0x4), region = 59 }
  0xd9   :  { %1135 = vsyncpa [#allocation3], 1 }
  0xda   :  { %1137 = vsyncpa [#allocation3 + $0x1], 1 }

</bundles_post_ra>
